<compile_context>
chip_gen: v7x
topology: tpu7x:2x2x1
jax: 0.10.0
libtpu: 0.0.40
codegen_flags: <defaults>
</compile_context>

<pallas_src>
import functools

import jax
import jax.numpy as jnp
from jax.experimental import pallas as pl
from jax.experimental.pallas import tpu as pltpu


# ----------------------------- Pallas kernel ------------------------------ #

def transformer_block_kernel(x_ref, norms_ref, wqkv_ref, bqkv_ref,
                             wo_ref, bo_ref, w1_ref, b1_ref, w2_ref, b2_ref,
                             o_ref, *, nhead):
    """One batch element of the full TransformerBlock forward.

    x_ref:     (1, S, D)
    norms_ref: (8, D)   rows: [outer_g1, outer_b1, layer_g1, layer_b1,
                               layer_g2, layer_b2, outer_g2, outer_b2]
    wqkv_ref:  (D, 3D)  packed Q|K|V projection,  bqkv_ref: (1, 3D)
    wo_ref:    (D, D)   attention output proj,    bo_ref:   (1, D)
    w1_ref:    (D, F)   FFN up,                   b1_ref:   (1, F)
    w2_ref:    (F, D)   FFN down,                 b2_ref:   (1, D)
    o_ref:     (1, S, D)
    """
    S, D = x_ref.shape[1], x_ref.shape[2]
    hd = D // nhead
    scale = 1.0 / float(hd) ** 0.5

    def ln(v, row):
        g = norms_ref[row:row + 1, :]          # (1, D)
        b = norms_ref[row + 1:row + 2, :]      # (1, D)
        mu = jnp.mean(v, axis=-1, keepdims=True)
        c = v - mu
        var = jnp.mean(c * c, axis=-1, keepdims=True)
        return c * jax.lax.rsqrt(var + 1e-5) * g + b

    x = x_ref[0]                               # (S, D) f32
    h = ln(x, 0)                               # TransformerBlock.norm1

    # ---- multi-head self-attention (packed QKV: one K=D matmul) ---- #
    qkv = jnp.dot(h, wqkv_ref[...],
                  preferred_element_type=jnp.float32) + bqkv_ref[...]
    heads = []
    for hh in range(nhead):                    # unrolled at trace time
        q = qkv[:, hh * hd:(hh + 1) * hd] * scale
        k = qkv[:, D + hh * hd:D + (hh + 1) * hd]
        v = qkv[:, 2 * D + hh * hd:2 * D + (hh + 1) * hd]
        # q @ k^T without materializing a transpose
        s = jax.lax.dot_general(q, k, (((1,), (1,)), ((), ())),
                                preferred_element_type=jnp.float32)   # (S, S)
        s = s - jnp.max(s, axis=-1, keepdims=True)
        p = jnp.exp(s)
        p = p / jnp.sum(p, axis=-1, keepdims=True)
        heads.append(jnp.dot(p, v, preferred_element_type=jnp.float32))
    attn = jnp.concatenate(heads, axis=-1)                            # (S, D)
    attn = jnp.dot(attn, wo_ref[...],
                   preferred_element_type=jnp.float32) + bo_ref[...]

    h = ln(h + attn, 2)                        # encoder-layer norm1 (post-norm)

    # ---- feed-forward ---- #
    f = jnp.dot(h, w1_ref[...],
                preferred_element_type=jnp.float32) + b1_ref[...]
    f = jnp.maximum(f, 0.0)
    f = jnp.dot(f, w2_ref[...],
                preferred_element_type=jnp.float32) + b2_ref[...]

    h = ln(h + f, 4)                           # encoder-layer norm2
    o_ref[0] = ln(h, 6).astype(o_ref.dtype)    # TransformerBlock.norm2


def transformer_block(x, params, nhead):
    """x: (B, S, D) float32.  Returns (B, S, D) float32."""
    B, S, D = x.shape
    Fd = params['w1'].shape[1]
    kernel = functools.partial(transformer_block_kernel, nhead=nhead)

    return pl.pallas_call(
        kernel,
        out_shape=jax.ShapeDtypeStruct((B, S, D), jnp.float32),
        grid_spec=pltpu.PrefetchScalarGridSpec(
            num_scalar_prefetch=0,
            grid=(B,),
            in_specs=[
                pl.BlockSpec((1, S, D), lambda b: (b, 0, 0)),     # x
                pl.BlockSpec((8, D), lambda b: (0, 0)),           # norms
                pl.BlockSpec((D, 3 * D), lambda b: (0, 0)),       # wqkv
                pl.BlockSpec((1, 3 * D), lambda b: (0, 0)),       # bqkv
                pl.BlockSpec((D, D), lambda b: (0, 0)),           # wo
                pl.BlockSpec((1, D), lambda b: (0, 0)),           # bo
                pl.BlockSpec((D, Fd), lambda b: (0, 0)),          # w1
                pl.BlockSpec((1, Fd), lambda b: (0, 0)),          # b1
                pl.BlockSpec((Fd, D), lambda b: (0, 0)),          # w2
                pl.BlockSpec((1, D), lambda b: (0, 0)),           # b2
            ],
            out_specs=pl.BlockSpec((1, S, D), lambda b: (b, 0, 0)),
        ),
        compiler_params=pltpu.CompilerParams(
            dimension_semantics=("parallel",)),
    )(x, params['norms'], params['wqkv'], params['bqkv'],
      params['wo'], params['bo'], params['w1'], params['b1'],
      params['w2'], params['b2'])


# --------------------------- deterministic params --------------------------- #

def make_params(key, d_model, nhead, dim_ff):
    assert d_model % nhead == 0
    k0, k1, k2, k3, k4, k5 = jax.random.split(key, 6)
    s = 0.1
    wqkv = s * jax.random.normal(k0, (d_model, 3 * d_model), jnp.float32)
    bqkv = 0.01 * jax.random.normal(k1, (1, 3 * d_model), jnp.float32)
    wo = s * jax.random.normal(k2, (d_model, d_model), jnp.float32)
    bo = 0.01 * jax.random.normal(k3, (1, d_model), jnp.float32)
    w1 = s * jax.random.normal(k4, (d_model, dim_ff), jnp.float32)
    b1 = 0.01 * jnp.ones((1, dim_ff), jnp.float32)
    w2 = s * jax.random.normal(k5, (dim_ff, d_model), jnp.float32)
    b2 = 0.01 * jnp.ones((1, d_model), jnp.float32)

    i = jnp.arange(d_model, dtype=jnp.float32)

    def gamma(phase):
        return 1.0 + 0.1 * jnp.cos(i + phase)

    def beta(phase):
        return 0.05 * jnp.sin(i + phase)

    # rows: outer norm1 (g,b), layer norm1 (g,b), layer norm2 (g,b), outer norm2 (g,b)
    norms = jnp.stack([gamma(0.0), beta(0.0), gamma(0.5), beta(0.5),
                       gamma(1.0), beta(1.0), gamma(1.5), beta(1.5)], axis=0)
    return dict(norms=norms, wqkv=wqkv, bqkv=bqkv, wo=wo, bo=bo,
                w1=w1, b1=b1, w2=w2, b2=b2)


# ------------------------------ pure-JAX reference -------------------------- #

def reference_forward(x, params, nhead):
    hp = jax.lax.Precision.HIGHEST

    def ln(v, row):
        g = params['norms'][row]
        b = params['norms'][row + 1]
        mu = v.mean(-1, keepdims=True)
        c = v - mu
        var = (c * c).mean(-1, keepdims=True)
        return c / jnp.sqrt(var + 1e-5) * g + b

    B, S, D = x.shape
    hd = D // nhead

    h = ln(x, 0)                                                   # outer norm1
    qkv = jnp.einsum('bsd,de->bse', h, params['wqkv'],
                     precision=hp) + params['bqkv'][0]
    q, k, v = jnp.split(qkv, 3, axis=-1)
    q = q.reshape(B, S, nhead, hd)
    k = k.reshape(B, S, nhead, hd)
    v = v.reshape(B, S, nhead, hd)
    s = jnp.einsum('bqhd,bkhd->bhqk', q, k, precision=hp) / jnp.sqrt(float(hd))
    p = jax.nn.softmax(s, axis=-1)
    a = jnp.einsum('bhqk,bkhd->bqhd', p, v, precision=hp).reshape(B, S, D)
    a = jnp.einsum('bsd,de->bse', a, params['wo'],
                   precision=hp) + params['bo'][0]
    h = ln(h + a, 2)                                               # layer norm1
    f = jnp.maximum(jnp.einsum('bsd,df->bsf', h, params['w1'],
                               precision=hp) + params['b1'][0], 0.0)
    f = jnp.einsum('bsf,fd->bsd', f, params['w2'],
                   precision=hp) + params['b2'][0]
    h = ln(h + f, 4)                                               # layer norm2
    return ln(h, 6)                                                # outer norm2


# --------------------------------- main ------------------------------------ #

if __name__ == "__main__":
    B, S = 2, 8
    d_model, nhead, dim_ff = 32, 4, 64

    key = jax.random.PRNGKey(0)
    kx, kp = jax.random.split(key)
    x = jax.random.normal(kx, (B, S, d_model), jnp.float32)
    params = make_params(kp, d_model, nhead, dim_ff)

    out = jax.block_until_ready(transformer_block(x, params, nhead))
    assert out.shape == (B, S, d_model), out.shape

    ref = jax.block_until_ready(reference_forward(x, params, nhead))
    max_diff = float(jnp.max(jnp.abs(out - ref)))
    assert jnp.allclose(out, ref, rtol=2e-3, atol=2e-3), \
        f"max abs diff {max_diff}"

    print("KERNEL_OK")
</pallas_src>

<mosaic_0001>
module attributes {stable_mosaic.version = 11 : i64} {
  func.func @transformer_block_kernel(%arg0: i32, %arg1: memref<1x8x32xf32, #tpu.memory_space<vmem>>, %arg2: memref<8x32xf32, #tpu.memory_space<vmem>>, %arg3: memref<32x96xf32, #tpu.memory_space<vmem>>, %arg4: memref<1x96xf32, #tpu.memory_space<vmem>>, %arg5: memref<32x32xf32, #tpu.memory_space<vmem>>, %arg6: memref<1x32xf32, #tpu.memory_space<vmem>>, %arg7: memref<32x64xf32, #tpu.memory_space<vmem>>, %arg8: memref<1x64xf32, #tpu.memory_space<vmem>>, %arg9: memref<64x32xf32, #tpu.memory_space<vmem>>, %arg10: memref<1x32xf32, #tpu.memory_space<vmem>>, %arg11: memref<1x8x32xf32, #tpu.memory_space<vmem>>) attributes {dimension_semantics = [#tpu.dimension_semantics<parallel>], iteration_bounds = array<i64: 2>, scalar_prefetch = 0 : i64, scratch_operands = 0 : i64, tpu.core_type = #tpu.core_type<tc>, window_params = [{transform_indices = @transform_0, window_bounds = array<i64: 1, 8, 32>}, {pipeline_mode = #tpu.pipeline_mode<synchronous>, transform_indices = @transform_1, window_bounds = array<i64: 8, 32>}, {pipeline_mode = #tpu.pipeline_mode<synchronous>, transform_indices = @transform_2, window_bounds = array<i64: 32, 96>}, {pipeline_mode = #tpu.pipeline_mode<synchronous>, transform_indices = @transform_3, window_bounds = array<i64: 1, 96>}, {pipeline_mode = #tpu.pipeline_mode<synchronous>, transform_indices = @transform_4, window_bounds = array<i64: 32, 32>}, {pipeline_mode = #tpu.pipeline_mode<synchronous>, transform_indices = @transform_5, window_bounds = array<i64: 1, 32>}, {pipeline_mode = #tpu.pipeline_mode<synchronous>, transform_indices = @transform_6, window_bounds = array<i64: 32, 64>}, {pipeline_mode = #tpu.pipeline_mode<synchronous>, transform_indices = @transform_7, window_bounds = array<i64: 1, 64>}, {pipeline_mode = #tpu.pipeline_mode<synchronous>, transform_indices = @transform_8, window_bounds = array<i64: 64, 32>}, {pipeline_mode = #tpu.pipeline_mode<synchronous>, transform_indices = @transform_9, window_bounds = array<i64: 1, 32>}, {transform_indices = @transform_10, window_bounds = array<i64: 1, 8, 32>}]} {
    %c0 = arith.constant 0 : index
    %c0_0 = arith.constant 0 : index
    %c0_1 = arith.constant 0 : index
    %0 = vector.load %arg1[%c0, %c0_0, %c0_1] : memref<1x8x32xf32, #tpu.memory_space<vmem>>, vector<1x8x32xf32>
    %1 = vector.shape_cast %0 : vector<1x8x32xf32> to vector<8x32xf32>
    %c0_2 = arith.constant 0 : index
    %c0_3 = arith.constant 0 : index
    %2 = vector.load %arg2[%c0_2, %c0_3] : memref<8x32xf32, #tpu.memory_space<vmem>>, vector<1x32xf32>
    %c1 = arith.constant 1 : index
    %c0_4 = arith.constant 0 : index
    %3 = vector.load %arg2[%c1, %c0_4] : memref<8x32xf32, #tpu.memory_space<vmem>>, vector<1x32xf32>
    %cst = arith.constant dense<0.000000e+00> : vector<8xf32>
    %4 = vector.multi_reduction <add>, %1, %cst [1] : vector<8x32xf32> to vector<8xf32>
    %5 = vector.shape_cast %4 : vector<8xf32> to vector<8x1xf32>
    %cst_5 = arith.constant 3.200000e+01 : f32
    %6 = vector.broadcast %cst_5 : f32 to vector<8x1xf32>
    %7 = arith.divf %5, %6 : vector<8x1xf32>
    %8 = vector.broadcast %7 : vector<8x1xf32> to vector<8x32xf32>
    %9 = arith.subf %1, %8 : vector<8x32xf32>
    %10 = arith.mulf %9, %9 : vector<8x32xf32>
    %cst_6 = arith.constant dense<0.000000e+00> : vector<8xf32>
    %11 = vector.multi_reduction <add>, %10, %cst_6 [1] : vector<8x32xf32> to vector<8xf32>
    %12 = vector.shape_cast %11 : vector<8xf32> to vector<8x1xf32>
    %cst_7 = arith.constant 3.200000e+01 : f32
    %13 = vector.broadcast %cst_7 : f32 to vector<8x1xf32>
    %14 = arith.divf %12, %13 : vector<8x1xf32>
    %cst_8 = arith.constant 9.99999974E-6 : f32
    %15 = vector.broadcast %cst_8 : f32 to vector<8x1xf32>
    %16 = arith.addf %14, %15 : vector<8x1xf32>
    %17 = math.rsqrt %16 : vector<8x1xf32>
    %18 = vector.broadcast %17 : vector<8x1xf32> to vector<8x32xf32>
    %19 = arith.mulf %9, %18 : vector<8x32xf32>
    %20 = vector.broadcast %2 : vector<1x32xf32> to vector<8x32xf32>
    %21 = arith.mulf %19, %20 : vector<8x32xf32>
    %22 = vector.broadcast %3 : vector<1x32xf32> to vector<8x32xf32>
    %23 = arith.addf %21, %22 : vector<8x32xf32>
    %c0_9 = arith.constant 0 : index
    %c0_10 = arith.constant 0 : index
    %24 = vector.load %arg3[%c0_9, %c0_10] : memref<32x96xf32, #tpu.memory_space<vmem>>, vector<32x96xf32>
    %cst_11 = arith.constant dense<0.000000e+00> : vector<8x96xf32>
    %25 = tpu.matmul %23, %24, %cst_11 {dimension_numbers = #tpu.dot_dimension_numbers<[1], [0], [0], [1], [0, 0, 1, 1], [], []>} : vector<8x32xf32>, vector<32x96xf32>, vector<8x96xf32> -> vector<8x96xf32>
    %c0_12 = arith.constant 0 : index
    %c0_13 = arith.constant 0 : index
    %26 = vector.load %arg4[%c0_12, %c0_13] : memref<1x96xf32, #tpu.memory_space<vmem>>, vector<1x96xf32>
    %27 = vector.broadcast %26 : vector<1x96xf32> to vector<8x96xf32>
    %28 = arith.addf %25, %27 : vector<8x96xf32>
    %29 = vector.extract_strided_slice %28 {offsets = [0, 0], sizes = [8, 8], strides = [1, 1]} : vector<8x96xf32> to vector<8x8xf32>
    %cst_14 = arith.constant 0.353553385 : f32
    %30 = vector.broadcast %cst_14 : f32 to vector<8x8xf32>
    %31 = arith.mulf %29, %30 : vector<8x8xf32>
    %32 = vector.extract_strided_slice %28 {offsets = [0, 32], sizes = [8, 8], strides = [1, 1]} : vector<8x96xf32> to vector<8x8xf32>
    %33 = vector.extract_strided_slice %28 {offsets = [0, 64], sizes = [8, 8], strides = [1, 1]} : vector<8x96xf32> to vector<8x8xf32>
    %cst_15 = arith.constant dense<0.000000e+00> : vector<8x8xf32>
    %34 = tpu.matmul %31, %32, %cst_15 {dimension_numbers = #tpu.dot_dimension_numbers<[1], [1], [0], [0], [0, 0, 1, 0], [], []>} : vector<8x8xf32>, vector<8x8xf32>, vector<8x8xf32> -> vector<8x8xf32>
    %cst_16 = arith.constant dense<0xFF800000> : vector<8xf32>
    %35 = vector.multi_reduction <maximumf>, %34, %cst_16 [1] : vector<8x8xf32> to vector<8xf32>
    %36 = vector.shape_cast %35 : vector<8xf32> to vector<8x1xf32>
    %37 = vector.broadcast %36 : vector<8x1xf32> to vector<8x8xf32>
    %38 = arith.subf %34, %37 : vector<8x8xf32>
    %39 = math.exp %38 : vector<8x8xf32>
    %cst_17 = arith.constant dense<0.000000e+00> : vector<8xf32>
    %40 = vector.multi_reduction <add>, %39, %cst_17 [1] : vector<8x8xf32> to vector<8xf32>
    %41 = vector.shape_cast %40 : vector<8xf32> to vector<8x1xf32>
    %42 = vector.broadcast %41 : vector<8x1xf32> to vector<8x8xf32>
    %43 = arith.divf %39, %42 : vector<8x8xf32>
    %cst_18 = arith.constant dense<0.000000e+00> : vector<8x8xf32>
    %44 = tpu.matmul %43, %33, %cst_18 {dimension_numbers = #tpu.dot_dimension_numbers<[1], [0], [0], [1], [0, 0, 1, 1], [], []>} : vector<8x8xf32>, vector<8x8xf32>, vector<8x8xf32> -> vector<8x8xf32>
    %45 = vector.extract_strided_slice %28 {offsets = [0, 8], sizes = [8, 8], strides = [1, 1]} : vector<8x96xf32> to vector<8x8xf32>
    %cst_19 = arith.constant 0.353553385 : f32
    %46 = vector.broadcast %cst_19 : f32 to vector<8x8xf32>
    %47 = arith.mulf %45, %46 : vector<8x8xf32>
    %48 = vector.extract_strided_slice %28 {offsets = [0, 40], sizes = [8, 8], strides = [1, 1]} : vector<8x96xf32> to vector<8x8xf32>
    %49 = vector.extract_strided_slice %28 {offsets = [0, 72], sizes = [8, 8], strides = [1, 1]} : vector<8x96xf32> to vector<8x8xf32>
    %cst_20 = arith.constant dense<0.000000e+00> : vector<8x8xf32>
    %50 = tpu.matmul %47, %48, %cst_20 {dimension_numbers = #tpu.dot_dimension_numbers<[1], [1], [0], [0], [0, 0, 1, 0], [], []>} : vector<8x8xf32>, vector<8x8xf32>, vector<8x8xf32> -> vector<8x8xf32>
    %cst_21 = arith.constant dense<0xFF800000> : vector<8xf32>
    %51 = vector.multi_reduction <maximumf>, %50, %cst_21 [1] : vector<8x8xf32> to vector<8xf32>
    %52 = vector.shape_cast %51 : vector<8xf32> to vector<8x1xf32>
    %53 = vector.broadcast %52 : vector<8x1xf32> to vector<8x8xf32>
    %54 = arith.subf %50, %53 : vector<8x8xf32>
    %55 = math.exp %54 : vector<8x8xf32>
    %cst_22 = arith.constant dense<0.000000e+00> : vector<8xf32>
    %56 = vector.multi_reduction <add>, %55, %cst_22 [1] : vector<8x8xf32> to vector<8xf32>
    %57 = vector.shape_cast %56 : vector<8xf32> to vector<8x1xf32>
    %58 = vector.broadcast %57 : vector<8x1xf32> to vector<8x8xf32>
    %59 = arith.divf %55, %58 : vector<8x8xf32>
    %cst_23 = arith.constant dense<0.000000e+00> : vector<8x8xf32>
    %60 = tpu.matmul %59, %49, %cst_23 {dimension_numbers = #tpu.dot_dimension_numbers<[1], [0], [0], [1], [0, 0, 1, 1], [], []>} : vector<8x8xf32>, vector<8x8xf32>, vector<8x8xf32> -> vector<8x8xf32>
    %61 = vector.extract_strided_slice %28 {offsets = [0, 16], sizes = [8, 8], strides = [1, 1]} : vector<8x96xf32> to vector<8x8xf32>
    %cst_24 = arith.constant 0.353553385 : f32
    %62 = vector.broadcast %cst_24 : f32 to vector<8x8xf32>
    %63 = arith.mulf %61, %62 : vector<8x8xf32>
    %64 = vector.extract_strided_slice %28 {offsets = [0, 48], sizes = [8, 8], strides = [1, 1]} : vector<8x96xf32> to vector<8x8xf32>
    %65 = vector.extract_strided_slice %28 {offsets = [0, 80], sizes = [8, 8], strides = [1, 1]} : vector<8x96xf32> to vector<8x8xf32>
    %cst_25 = arith.constant dense<0.000000e+00> : vector<8x8xf32>
    %66 = tpu.matmul %63, %64, %cst_25 {dimension_numbers = #tpu.dot_dimension_numbers<[1], [1], [0], [0], [0, 0, 1, 0], [], []>} : vector<8x8xf32>, vector<8x8xf32>, vector<8x8xf32> -> vector<8x8xf32>
    %cst_26 = arith.constant dense<0xFF800000> : vector<8xf32>
    %67 = vector.multi_reduction <maximumf>, %66, %cst_26 [1] : vector<8x8xf32> to vector<8xf32>
    %68 = vector.shape_cast %67 : vector<8xf32> to vector<8x1xf32>
    %69 = vector.broadcast %68 : vector<8x1xf32> to vector<8x8xf32>
    %70 = arith.subf %66, %69 : vector<8x8xf32>
    %71 = math.exp %70 : vector<8x8xf32>
    %cst_27 = arith.constant dense<0.000000e+00> : vector<8xf32>
    %72 = vector.multi_reduction <add>, %71, %cst_27 [1] : vector<8x8xf32> to vector<8xf32>
    %73 = vector.shape_cast %72 : vector<8xf32> to vector<8x1xf32>
    %74 = vector.broadcast %73 : vector<8x1xf32> to vector<8x8xf32>
    %75 = arith.divf %71, %74 : vector<8x8xf32>
    %cst_28 = arith.constant dense<0.000000e+00> : vector<8x8xf32>
    %76 = tpu.matmul %75, %65, %cst_28 {dimension_numbers = #tpu.dot_dimension_numbers<[1], [0], [0], [1], [0, 0, 1, 1], [], []>} : vector<8x8xf32>, vector<8x8xf32>, vector<8x8xf32> -> vector<8x8xf32>
    %77 = vector.extract_strided_slice %28 {offsets = [0, 24], sizes = [8, 8], strides = [1, 1]} : vector<8x96xf32> to vector<8x8xf32>
    %cst_29 = arith.constant 0.353553385 : f32
    %78 = vector.broadcast %cst_29 : f32 to vector<8x8xf32>
    %79 = arith.mulf %77, %78 : vector<8x8xf32>
    %80 = vector.extract_strided_slice %28 {offsets = [0, 56], sizes = [8, 8], strides = [1, 1]} : vector<8x96xf32> to vector<8x8xf32>
    %81 = vector.extract_strided_slice %28 {offsets = [0, 88], sizes = [8, 8], strides = [1, 1]} : vector<8x96xf32> to vector<8x8xf32>
    %cst_30 = arith.constant dense<0.000000e+00> : vector<8x8xf32>
    %82 = tpu.matmul %79, %80, %cst_30 {dimension_numbers = #tpu.dot_dimension_numbers<[1], [1], [0], [0], [0, 0, 1, 0], [], []>} : vector<8x8xf32>, vector<8x8xf32>, vector<8x8xf32> -> vector<8x8xf32>
    %cst_31 = arith.constant dense<0xFF800000> : vector<8xf32>
    %83 = vector.multi_reduction <maximumf>, %82, %cst_31 [1] : vector<8x8xf32> to vector<8xf32>
    %84 = vector.shape_cast %83 : vector<8xf32> to vector<8x1xf32>
    %85 = vector.broadcast %84 : vector<8x1xf32> to vector<8x8xf32>
    %86 = arith.subf %82, %85 : vector<8x8xf32>
    %87 = math.exp %86 : vector<8x8xf32>
    %cst_32 = arith.constant dense<0.000000e+00> : vector<8xf32>
    %88 = vector.multi_reduction <add>, %87, %cst_32 [1] : vector<8x8xf32> to vector<8xf32>
    %89 = vector.shape_cast %88 : vector<8xf32> to vector<8x1xf32>
    %90 = vector.broadcast %89 : vector<8x1xf32> to vector<8x8xf32>
    %91 = arith.divf %87, %90 : vector<8x8xf32>
    %cst_33 = arith.constant dense<0.000000e+00> : vector<8x8xf32>
    %92 = tpu.matmul %91, %81, %cst_33 {dimension_numbers = #tpu.dot_dimension_numbers<[1], [0], [0], [1], [0, 0, 1, 1], [], []>} : vector<8x8xf32>, vector<8x8xf32>, vector<8x8xf32> -> vector<8x8xf32>
    %93 = tpu.concatenate %44, %60, %76, %92 in 1 : vector<8x8xf32>, vector<8x8xf32>, vector<8x8xf32>, vector<8x8xf32> -> vector<8x32xf32>
    %c0_34 = arith.constant 0 : index
    %c0_35 = arith.constant 0 : index
    %94 = vector.load %arg5[%c0_34, %c0_35] : memref<32x32xf32, #tpu.memory_space<vmem>>, vector<32x32xf32>
    %cst_36 = arith.constant dense<0.000000e+00> : vector<8x32xf32>
    %95 = tpu.matmul %93, %94, %cst_36 {dimension_numbers = #tpu.dot_dimension_numbers<[1], [0], [0], [1], [0, 0, 1, 1], [], []>} : vector<8x32xf32>, vector<32x32xf32>, vector<8x32xf32> -> vector<8x32xf32>
    %c0_37 = arith.constant 0 : index
    %c0_38 = arith.constant 0 : index
    %96 = vector.load %arg6[%c0_37, %c0_38] : memref<1x32xf32, #tpu.memory_space<vmem>>, vector<1x32xf32>
    %97 = vector.broadcast %96 : vector<1x32xf32> to vector<8x32xf32>
    %98 = arith.addf %95, %97 : vector<8x32xf32>
    %99 = arith.addf %23, %98 : vector<8x32xf32>
    %c2 = arith.constant 2 : index
    %c0_39 = arith.constant 0 : index
    %100 = vector.load %arg2[%c2, %c0_39] : memref<8x32xf32, #tpu.memory_space<vmem>>, vector<1x32xf32>
    %c3 = arith.constant 3 : index
    %c0_40 = arith.constant 0 : index
    %101 = vector.load %arg2[%c3, %c0_40] : memref<8x32xf32, #tpu.memory_space<vmem>>, vector<1x32xf32>
    %cst_41 = arith.constant dense<0.000000e+00> : vector<8xf32>
    %102 = vector.multi_reduction <add>, %99, %cst_41 [1] : vector<8x32xf32> to vector<8xf32>
    %103 = vector.shape_cast %102 : vector<8xf32> to vector<8x1xf32>
    %cst_42 = arith.constant 3.200000e+01 : f32
    %104 = vector.broadcast %cst_42 : f32 to vector<8x1xf32>
    %105 = arith.divf %103, %104 : vector<8x1xf32>
    %106 = vector.broadcast %105 : vector<8x1xf32> to vector<8x32xf32>
    %107 = arith.subf %99, %106 : vector<8x32xf32>
    %108 = arith.mulf %107, %107 : vector<8x32xf32>
    %cst_43 = arith.constant dense<0.000000e+00> : vector<8xf32>
    %109 = vector.multi_reduction <add>, %108, %cst_43 [1] : vector<8x32xf32> to vector<8xf32>
    %110 = vector.shape_cast %109 : vector<8xf32> to vector<8x1xf32>
    %cst_44 = arith.constant 3.200000e+01 : f32
    %111 = vector.broadcast %cst_44 : f32 to vector<8x1xf32>
    %112 = arith.divf %110, %111 : vector<8x1xf32>
    %cst_45 = arith.constant 9.99999974E-6 : f32
    %113 = vector.broadcast %cst_45 : f32 to vector<8x1xf32>
    %114 = arith.addf %112, %113 : vector<8x1xf32>
    %115 = math.rsqrt %114 : vector<8x1xf32>
    %116 = vector.broadcast %115 : vector<8x1xf32> to vector<8x32xf32>
    %117 = arith.mulf %107, %116 : vector<8x32xf32>
    %118 = vector.broadcast %100 : vector<1x32xf32> to vector<8x32xf32>
    %119 = arith.mulf %117, %118 : vector<8x32xf32>
    %120 = vector.broadcast %101 : vector<1x32xf32> to vector<8x32xf32>
    %121 = arith.addf %119, %120 : vector<8x32xf32>
    %c0_46 = arith.constant 0 : index
    %c0_47 = arith.constant 0 : index
    %122 = vector.load %arg7[%c0_46, %c0_47] : memref<32x64xf32, #tpu.memory_space<vmem>>, vector<32x64xf32>
    %cst_48 = arith.constant dense<0.000000e+00> : vector<8x64xf32>
    %123 = tpu.matmul %121, %122, %cst_48 {dimension_numbers = #tpu.dot_dimension_numbers<[1], [0], [0], [1], [0, 0, 1, 1], [], []>} : vector<8x32xf32>, vector<32x64xf32>, vector<8x64xf32> -> vector<8x64xf32>
    %c0_49 = arith.constant 0 : index
    %c0_50 = arith.constant 0 : index
    %124 = vector.load %arg8[%c0_49, %c0_50] : memref<1x64xf32, #tpu.memory_space<vmem>>, vector<1x64xf32>
    %125 = vector.broadcast %124 : vector<1x64xf32> to vector<8x64xf32>
    %126 = arith.addf %123, %125 : vector<8x64xf32>
    %cst_51 = arith.constant 0.000000e+00 : f32
    %127 = vector.broadcast %cst_51 : f32 to vector<8x64xf32>
    %128 = arith.maximumf %126, %127 : vector<8x64xf32>
    %c0_52 = arith.constant 0 : index
    %c0_53 = arith.constant 0 : index
    %129 = vector.load %arg9[%c0_52, %c0_53] : memref<64x32xf32, #tpu.memory_space<vmem>>, vector<64x32xf32>
    %cst_54 = arith.constant dense<0.000000e+00> : vector<8x32xf32>
    %130 = tpu.matmul %128, %129, %cst_54 {dimension_numbers = #tpu.dot_dimension_numbers<[1], [0], [0], [1], [0, 0, 1, 1], [], []>} : vector<8x64xf32>, vector<64x32xf32>, vector<8x32xf32> -> vector<8x32xf32>
    %c0_55 = arith.constant 0 : index
    %c0_56 = arith.constant 0 : index
    %131 = vector.load %arg10[%c0_55, %c0_56] : memref<1x32xf32, #tpu.memory_space<vmem>>, vector<1x32xf32>
    %132 = vector.broadcast %131 : vector<1x32xf32> to vector<8x32xf32>
    %133 = arith.addf %130, %132 : vector<8x32xf32>
    %134 = arith.addf %121, %133 : vector<8x32xf32>
    %c4 = arith.constant 4 : index
    %c0_57 = arith.constant 0 : index
    %135 = vector.load %arg2[%c4, %c0_57] : memref<8x32xf32, #tpu.memory_space<vmem>>, vector<1x32xf32>
    %c5 = arith.constant 5 : index
    %c0_58 = arith.constant 0 : index
    %136 = vector.load %arg2[%c5, %c0_58] : memref<8x32xf32, #tpu.memory_space<vmem>>, vector<1x32xf32>
    %cst_59 = arith.constant dense<0.000000e+00> : vector<8xf32>
    %137 = vector.multi_reduction <add>, %134, %cst_59 [1] : vector<8x32xf32> to vector<8xf32>
    %138 = vector.shape_cast %137 : vector<8xf32> to vector<8x1xf32>
    %cst_60 = arith.constant 3.200000e+01 : f32
    %139 = vector.broadcast %cst_60 : f32 to vector<8x1xf32>
    %140 = arith.divf %138, %139 : vector<8x1xf32>
    %141 = vector.broadcast %140 : vector<8x1xf32> to vector<8x32xf32>
    %142 = arith.subf %134, %141 : vector<8x32xf32>
    %143 = arith.mulf %142, %142 : vector<8x32xf32>
    %cst_61 = arith.constant dense<0.000000e+00> : vector<8xf32>
    %144 = vector.multi_reduction <add>, %143, %cst_61 [1] : vector<8x32xf32> to vector<8xf32>
    %145 = vector.shape_cast %144 : vector<8xf32> to vector<8x1xf32>
    %cst_62 = arith.constant 3.200000e+01 : f32
    %146 = vector.broadcast %cst_62 : f32 to vector<8x1xf32>
    %147 = arith.divf %145, %146 : vector<8x1xf32>
    %cst_63 = arith.constant 9.99999974E-6 : f32
    %148 = vector.broadcast %cst_63 : f32 to vector<8x1xf32>
    %149 = arith.addf %147, %148 : vector<8x1xf32>
    %150 = math.rsqrt %149 : vector<8x1xf32>
    %151 = vector.broadcast %150 : vector<8x1xf32> to vector<8x32xf32>
    %152 = arith.mulf %142, %151 : vector<8x32xf32>
    %153 = vector.broadcast %135 : vector<1x32xf32> to vector<8x32xf32>
    %154 = arith.mulf %152, %153 : vector<8x32xf32>
    %155 = vector.broadcast %136 : vector<1x32xf32> to vector<8x32xf32>
    %156 = arith.addf %154, %155 : vector<8x32xf32>
    %c6 = arith.constant 6 : index
    %c0_64 = arith.constant 0 : index
    %157 = vector.load %arg2[%c6, %c0_64] : memref<8x32xf32, #tpu.memory_space<vmem>>, vector<1x32xf32>
    %c7 = arith.constant 7 : index
    %c0_65 = arith.constant 0 : index
    %158 = vector.load %arg2[%c7, %c0_65] : memref<8x32xf32, #tpu.memory_space<vmem>>, vector<1x32xf32>
    %cst_66 = arith.constant dense<0.000000e+00> : vector<8xf32>
    %159 = vector.multi_reduction <add>, %156, %cst_66 [1] : vector<8x32xf32> to vector<8xf32>
    %160 = vector.shape_cast %159 : vector<8xf32> to vector<8x1xf32>
    %cst_67 = arith.constant 3.200000e+01 : f32
    %161 = vector.broadcast %cst_67 : f32 to vector<8x1xf32>
    %162 = arith.divf %160, %161 : vector<8x1xf32>
    %163 = vector.broadcast %162 : vector<8x1xf32> to vector<8x32xf32>
    %164 = arith.subf %156, %163 : vector<8x32xf32>
    %165 = arith.mulf %164, %164 : vector<8x32xf32>
    %cst_68 = arith.constant dense<0.000000e+00> : vector<8xf32>
    %166 = vector.multi_reduction <add>, %165, %cst_68 [1] : vector<8x32xf32> to vector<8xf32>
    %167 = vector.shape_cast %166 : vector<8xf32> to vector<8x1xf32>
    %cst_69 = arith.constant 3.200000e+01 : f32
    %168 = vector.broadcast %cst_69 : f32 to vector<8x1xf32>
    %169 = arith.divf %167, %168 : vector<8x1xf32>
    %cst_70 = arith.constant 9.99999974E-6 : f32
    %170 = vector.broadcast %cst_70 : f32 to vector<8x1xf32>
    %171 = arith.addf %169, %170 : vector<8x1xf32>
    %172 = math.rsqrt %171 : vector<8x1xf32>
    %173 = vector.broadcast %172 : vector<8x1xf32> to vector<8x32xf32>
    %174 = arith.mulf %164, %173 : vector<8x32xf32>
    %175 = vector.broadcast %157 : vector<1x32xf32> to vector<8x32xf32>
    %176 = arith.mulf %174, %175 : vector<8x32xf32>
    %177 = vector.broadcast %158 : vector<1x32xf32> to vector<8x32xf32>
    %178 = arith.addf %176, %177 : vector<8x32xf32>
    %c0_71 = arith.constant 0 : index
    %c0_72 = arith.constant 0 : index
    %c0_73 = arith.constant 0 : index
    %179 = vector.load %arg11[%c0_71, %c0_72, %c0_73] : memref<1x8x32xf32, #tpu.memory_space<vmem>>, vector<1x8x32xf32>
    %180 = vector.shape_cast %179 : vector<1x8x32xf32> to vector<8x32xf32>
    %181 = vector.shape_cast %178 : vector<8x32xf32> to vector<1x8x32xf32>
    tpu.vector_store %arg11[%c0_71, %c0_72, %c0_73], %181 {strides = array<i32>} : memref<1x8x32xf32, #tpu.memory_space<vmem>>, vector<1x8x32xf32>,
    return
  }
  func.func @transform_0(%arg0: i32) -> (i32, i32, i32) {
    %c0_i32 = arith.constant 0 : i32
    %c0_i32_0 = arith.constant 0 : i32
    %c0_i32_1 = arith.constant 0 : i32
    return %arg0, %c0_i32, %c0_i32_0 : i32, i32, i32
  }
  func.func @transform_1(%arg0: i32) -> (i32, i32) {
    %c0_i32 = arith.constant 0 : i32
    %c0_i32_0 = arith.constant 0 : i32
    %c0_i32_1 = arith.constant 0 : i32
    return %c0_i32, %c0_i32_0 : i32, i32
  }
  func.func @transform_2(%arg0: i32) -> (i32, i32) {
    %c0_i32 = arith.constant 0 : i32
    %c0_i32_0 = arith.constant 0 : i32
    %c0_i32_1 = arith.constant 0 : i32
    return %c0_i32, %c0_i32_0 : i32, i32
  }
  func.func @transform_3(%arg0: i32) -> (i32, i32) {
    %c0_i32 = arith.constant 0 : i32
    %c0_i32_0 = arith.constant 0 : i32
    %c0_i32_1 = arith.constant 0 : i32
    return %c0_i32, %c0_i32_0 : i32, i32
  }
  func.func @transform_4(%arg0: i32) -> (i32, i32) {
    %c0_i32 = arith.constant 0 : i32
    %c0_i32_0 = arith.constant 0 : i32
    %c0_i32_1 = arith.constant 0 : i32
    return %c0_i32, %c0_i32_0 : i32, i32
  }
  func.func @transform_5(%arg0: i32) -> (i32, i32) {
    %c0_i32 = arith.constant 0 : i32
    %c0_i32_0 = arith.constant 0 : i32
    %c0_i32_1 = arith.constant 0 : i32
    return %c0_i32, %c0_i32_0 : i32, i32
  }
  func.func @transform_6(%arg0: i32) -> (i32, i32) {
    %c0_i32 = arith.constant 0 : i32
    %c0_i32_0 = arith.constant 0 : i32
    %c0_i32_1 = arith.constant 0 : i32
    return %c0_i32, %c0_i32_0 : i32, i32
  }
  func.func @transform_7(%arg0: i32) -> (i32, i32) {
    %c0_i32 = arith.constant 0 : i32
    %c0_i32_0 = arith.constant 0 : i32
    %c0_i32_1 = arith.constant 0 : i32
    return %c0_i32, %c0_i32_0 : i32, i32
  }
  func.func @transform_8(%arg0: i32) -> (i32, i32) {
    %c0_i32 = arith.constant 0 : i32
    %c0_i32_0 = arith.constant 0 : i32
    %c0_i32_1 = arith.constant 0 : i32
    return %c0_i32, %c0_i32_0 : i32, i32
  }
  func.func @transform_9(%arg0: i32) -> (i32, i32) {
    %c0_i32 = arith.constant 0 : i32
    %c0_i32_0 = arith.constant 0 : i32
    %c0_i32_1 = arith.constant 0 : i32
    return %c0_i32, %c0_i32_0 : i32, i32
  }
  func.func @transform_10(%arg0: i32) -> (i32, i32, i32) {
    %c0_i32 = arith.constant 0 : i32
    %c0_i32_0 = arith.constant 0 : i32
    %c0_i32_1 = arith.constant 0 : i32
    return %arg0, %c0_i32, %c0_i32_0 : i32, i32, i32
  }
}

</mosaic_0001>

<bundles_post_ra>
// kernel: tpu_custom_call.1
= control target key start
LH: loop header
LB: loop body
LE: loop exit
PB: predicated region body
PF: predicated region fallthrough
CT: control target
= control target key end

     0   :  { %s2483_s0 = inlined_call_operand.hbm [shape: f32[2,8,32], index: 0, kind: input, shape index: {}]   ;;  %s2484_s1 = inlined_call_operand.hbm [shape: f32[8,32], index: 1, kind: input, shape index: {}]   ;;  %s2485_s2 = inlined_call_operand.vmem [shape: f32[32,96], index: 2, kind: input, shape index: {}]   ;;  %s2486_s3 = inlined_call_operand.vmem [shape: f32[1,96], index: 3, kind: input, shape index: {}]   ;;  %s2487_s4 = inlined_call_operand.vmem [shape: f32[32,32], index: 4, kind: input, shape index: {}]   ;;  %s2488_s5 = inlined_call_operand.vmem [shape: f32[1,32], index: 5, kind: input, shape index: {}]   ;;  %s2489_s6 = inlined_call_operand.vmem [shape: f32[32,64], index: 6, kind: input, shape index: {}]   ;;  %s2490_s7 = inlined_call_operand.vmem [shape: f32[1,64], index: 7, kind: input, shape index: {}]   ;;  %s2491_s8 = inlined_call_operand.vmem [shape: f32[64,32], index: 8, kind: input, shape index: {}]   ;;  %s2492_s9 = inlined_call_operand.vmem [shape: f32[1,32], index: 9, kind: input, shape index: {}]   ;;  %s2493_s10 = inlined_call_operand.hbm [shape: f32[2,8,32], index: 10, kind: output, shape index: {}]  }
   0x1   :  { %2499 = sst [smem:[#allocation12_spill]] %s2484_s1 }
   0x2   :  { %15 = vsyncpa [#allocation3], 0 }
   0x3   :  { %17 = vsyncpa [#allocation3 + $0x1], 0 }
   0x4   :  { %18 = vsyncpa [#allocation6], 0 }
   0x5   :  { %19 = vsyncpa [#allocation4], 0 }
   0x6   :  { %21 = vsyncpa [#allocation4 + $0x1], 0  ;;  %s2116_s13 = smov 0   ;;  %s2118_s14 = smov 0  }
   0x7   :  { %s2120_s15 = smov 0   ;;  %s2122_s16 = smov 0  }
   0x8 LB: > { %s2137_s17 = sadd.s32 4294967295, %s2039_s16   ;;  %s1609_s18 = sadd.s32 4294967294, %s2039_s16   ;;  %s2039_s16 = sphi %s2122_s16, %s2519_s16   ;;  %s2035_s15 = sphi %s2120_s15, %s2522_s15   ;;  %s2031_s14 = sphi %s2118_s14, %s2521_s14   ;;  %s2027_s13 = sphi %s2116_s13, %s2520_s13  }
   0x9   : > { %p47_p0 = scmp.ne.s32.totalorder %s2031_s14, %s2027_s13  ;;  %p2496_p1 = scmp.eq.s32.totalorder %s2137_s17, 0 }
   0xa   : > { %p266_p3 = scmp.eq.s32.totalorder %s1609_s18, 1  ;;  %p1610_p5 = scmp.ge.s32.totalorder %s2039_s16, 1 }
   0xb   : > { %p2146_p4 = por %p2496_p1, %p47_p0  ;;  %p273_p7 = scmp.lt.s32.totalorder %s2039_s16, 3 }
   0xc   : > { %p2151_p6 = por %p266_p3, %p47_p0  ;;  %s2041_s22 = smov [#allocation5]  }
   0xd   : > { %s2500_s19 = scalar_select %p2146_p4, 1, 0 }
   0xe   : > { %s2501_s20 = scalar_select %p2151_p6, 1, 0 }
   0xf   : > { %p2156_p8 = pnand %p1610_p5, %p273_p7  ;;  %s286_s23 = sshll.u32 %s2041_s22, 4  ;;  %s287_s23 = int_to_ptr.vmem [resolvable:$true] %s286_s23 }
  0x10   : > { %s2164_s24 = sadd.s32 1, %s2039_s16   ;;  %s34_s28 = sadd.s32 1, %s2035_s15 }
  0x11   : > { %s2502_s21 = scalar_select %p2156_p8, 1, 0 }
  0x12   : > { %p1821_p10 = pneg %p2156_p8  ;;  %2503 = sst [smem:[#allocation11_spill]] %s2164_s24 }
  0x13   : > { %s31_s26 = ssub.s32 %s2039_s16, %s2164_s24  ;;  %s2506_s1 = sld [smem:[#allocation12_spill]] }
  0x14   : > { %p2168_p11 = pnand %p1821_p10, %p2496_p1  ;;  %p2174_p12 = scmp.eq.s32.totalorder %s31_s26, 0 }
  0x16   : > { %s2505_s27 = scalar_select %p2174_p12, 1, 0 }
  0x17   : > { %p1913_p3 = pneg %p2168_p11 }
  0x19   : > { %s1911_s11 = scalar_lea.hbm %s2506_s1, 128 }
  0x1a   : > { %p1912_p0 = scmp.ne.s32.totalorder %s2506_s1, %s1911_s11  ;;  %p1918_p10 = scmp.lt.u32.totalorder %s1911_s11, %s2506_s1 }
  0x1c   : > { %p1914_p5 = pnand %p1913_p3, %p1912_p0 }
  0x1e   : > { %p1915_p7 = pneg %p1914_p5 }
  0x20   : > { %p1920_p9 = pnand %p1918_p10, %p1915_p7 }
  0x22   : > { %1923 = shalt.err (!%p1920_p9)
}
  0x23   : > { %s1924_s26 = scalar_lea.vmem %s287_s23, 128  ;;  %p1932_p6 = scmp.lt.s32.totalorder %s287_s23, %s287_s23 }
  0x24   : > { %p1925_p1 = scmp.ne.s32.totalorder %s287_s23, %s1924_s26  ;;  %p1933_p4 = scmp.lt.s32.totalorder %s1924_s26, %s1924_s26 }
  0x26   : > { %p1927_p2 = pnand %p1925_p1, %p1913_p3  ;;  %p1934_p8 = por %p1933_p4, %p1932_p6 }
  0x28   : > { %p1928_p13 = pneg %p1927_p2 }
  0x2a   : > { %p1935_p12 = pnand %p1934_p8, %p1928_p13 }
  0x2c   : > { %1938 = shalt.err (!%p1935_p12)
}
  0x2d   : > { %1824 = dma.hbm_to_vmem [thread:$0]  (!%p2168_p11), %s2506_s1, 128, %s287_s23, [#allocation6]  }
  0x2e   : > { %p2507_p1 = scmp.ne.s32.totalorder %s2505_s27, 0  ;;  %p42_p2 = scmp.eq.s32.totalorder %s2039_s16, 0 }
  0x2f   : > { %p2508_p4 = scmp.ne.s32.totalorder %s2035_s15, %s2031_s14  ;;  %p2509_p6 = scmp.eq.s32.totalorder %s2137_s17, 1 }
  0x30   : > { %s2200_s24 = scalar_select %p2507_p1, %s2035_s15, %s34_s28  }
  0x31   : > { %p2208_p8 = por %p2509_p6, %p2508_p4  ;;  %p1834_p9 = scmp.lt.s32.totalorder %s2039_s16, 2 }
  0x32   : > { %s321_s11 = sand.u32 1, %s2035_s15   ;;  %p2511_p12 = pmov %p2508_p4 }
  0x33   : > { %s1613_s12 = sshll.u32 %s321_s11, 3  ;;  %s1614_s18 = sshll.u32 %s2039_s16, 7 }
  0x34   : > { %p43_p13 = por %p42_p2, %p2511_p12  ;;  %s2221_s23 = scalar_lea.hbm %s2483_s0, %s1614_s18 }
  0x35   : > { %s325_s27 = scalar_lea.vmem [#allocation2], %s1613_s12  ;;  %s322_s30 = scalar_lea.sflag [#allocation3], %s321_s11 }
  0x36   : > { %s332_s28 = sshll.u32 %s325_s27, 4  ;;  %p2223_p11 = pnand %p1834_p9, %p43_p13  ;;  %s2227_s28 = int_to_ptr.vmem [resolvable:$true] %s332_s28 }
  0x37   : > { %s1939_s1 = scalar_lea.hbm %s2221_s23, 128  ;;  %s1944_s22 = scalar_lea.hbm %s2483_s0, 256 }
  0x38   : > { %p1940_p0 = scmp.ne.s32.totalorder %s2221_s23, %s1939_s1  ;;  %p1941_p3 = pneg %p2223_p11 }
  0x39   : > { %p1945_p10 = scmp.lt.u32.totalorder %s2221_s23, %s2483_s0  ;;  %p1946_p1 = scmp.lt.u32.totalorder %s1944_s22, %s1939_s1 }
  0x3a   : > { %p1942_p5 = pnand %p1941_p3, %p1940_p0  ;;  %p1948_p4 = scmp.lt.u32.totalorder %s1939_s1, %s2221_s23 }
  0x3b   : > { %p1947_p2 = por %p1946_p1, %p1945_p10 }
  0x3c   : > { %p1943_p7 = pneg %p1942_p5 }
  0x3d   : > { %p1949_p6 = por %p1948_p4, %p1947_p2 }
  0x3f   : > { %p1950_p9 = pnand %p1949_p6, %p1943_p7 }
  0x41   : > { %1953 = shalt.err (!%p1950_p9)
}
  0x42   : > { %s1954_s11 = scalar_lea.vmem %s2227_s28, 128  ;;  %s2042_s18 = smov [#allocation2]  }
  0x43   : > { %p1955_p12 = scmp.ne.s32.totalorder %s2227_s28, %s1954_s11  ;;  %s1959_s12 = sshll.u32 %s2042_s18, 4  ;;  %s1960_s12 = int_to_ptr.vmem [resolvable:$false] %s1959_s12 }
  0x44   : > { %s1961_s26 = scalar_lea.vmem %s1960_s12, 256  ;;  %p1962_p5 = scmp.lt.s32.totalorder %s2227_s28, %s1960_s12 }
  0x45   : > { %p1957_p13 = pnand %p1955_p12, %p1941_p3  ;;  %p1963_p10 = scmp.lt.s32.totalorder %s1961_s26, %s1954_s11 }
  0x47   : > { %p1958_p0 = pneg %p1957_p13  ;;  %p1964_p1 = por %p1963_p10, %p1962_p5 }
  0x49   : > { %p1965_p2 = pnand %p1964_p1, %p1958_p0 }
  0x4b   : > { %1968 = shalt.err (!%p1965_p2)
}
  0x4c   : > { %1828 = dma.hbm_to_vmem [thread:$0]  (!%p2223_p11), %s2221_s23, 128, %s2227_s28, %s322_s30  }
  0x4d   : > { %p2513_p7 = scmp.ne.s32.totalorder %s2502_s21, 0 }
  0x4e   : > { %s2257_s1 = sand.u32 (!%p2513_p7), 1, %s2031_s14   ;;  %p2514_p3 = scmp.ne.s32.totalorder (!%p2513_p7), %s2500_s19, 0 }
  0x4f   : > { %341 = sbr.rel (%p2513_p7) target bundleno = 3208 (0xc88), region = 60  ;;  %s1616_s22 = sshll.u32 (!%p2513_p7), %s2257_s1, 3 }
  0x50   : > { %s344_s27 = scalar_lea.sflag (!%p2513_p7), [#allocation3], %s2257_s1  ;;  %s347_s11 = scalar_lea.vmem (!%p2513_p7), [#allocation2], %s1616_s22 }
  0x56   : > { %2014 = dma.done.wait (%p2514_p3), %s344_s27, 128  }
  0x57   : > { %2016 = vsyncadd (%p2514_p3), %s344_s27, 4294967168  ;;  %p2515_p11 = scmp.eq.s32.totalorder %s2137_s17, 0 }
  0x59   : > { %2018 = dma.done.wait (%p2515_p11), [#allocation6], 128   ;;  %p2516_p4 = pmov %p2515_p11 }
  0x5a   : > { %vm391_vm0 = vcmask 261120   ;;  %v388_v0 = vld [vmem:[%s347_s11] sm:$0xff]  ;;  %v418_v9 = vld [vmem:[%s2485_s2 + $0x10] sm:$0xff]  ;;  %v2043_v10 = vmov 0.0|0.0   ;;  %v419_v12 = vld [vmem:[%s2485_s2 + $0x18] sm:$0xff]  ;;  %vm2044_vm1 = vmmov 0  }
  0x5b   : > { %2020 = vsyncadd (%p2516_p4), [#allocation6], 4294967168  ;;  %v392_v1 = vsel %vm391_vm0, %v388_v0, 0.0  ;;  %v416_v7 = vld [vmem:[%s2485_s2] sm:$0xff]  ;;  %v417_v8 = vld [vmem:[%s2485_s2 + $0x8] sm:$0xff]  ;;  %1783 = vmatprep.subr.bf16.mxu1 %v2043_v10  ;;  %v2045_v13 = vmov 0.0   ;;  %v1787_v14 = vpack.c.bf16 %v419_v12, %v418_v9 }
  0x5c   : > { %393 = vadd.xlane.f32.xlu0 %v392_v1  ;;  %v1784_v11 = vpack.c.bf16 %v417_v8, %v416_v7  ;;  %1699 = vmatprep.mubr.msk.f32.mxu1 %vm2044_vm1, %v2045_v13  ;;  %v1619_v19 = vld [vmem:[#allocation5] ss:$0 sm:$0xff]  ;;  %v1620_v21 = vld [vmem:[#allocation5 + $0x1] ss:$0 sm:$0xff]  ;;  %v1621_v24 = vld [vmem:[%s2486_s3] ss:$0 sm:$0xff] }
  0x5d   : > { %1712 = vmatprep.subr.mxu0 %v2045_v13  ;;  %1714 = vmatprep.mubr.msk.f32.mxu0 %vm2044_vm1, %v2045_v13  ;;  %s2046_s11 = smov 96   ;;  %s2047_s19 = smov 120   ;;  %vm504_vm2 = vcmask 64512   ;;  %vm1175_vm3 = vcmask 130048   ;;  %vm1177_vm4 = vcmask 195584   ;;  %vm1389_vm5 = vcmask 523264  }
  0x5e   : > { %1785 = vmatpush3.bf16.msra.mxu1 %v1784_v11  ;;  %s2048_s21 = smov 88   ;;  %s2049_s23 = smov 80  }
  0x5f   : > { %1786 = vmatprep.subr.bf16.mxu1 %v2043_v10  ;;  %s2050_s28 = smov 72   ;;  %s2051_s29 = smov 112  }
  0x60   : > { %s2052_s30 = smov 104   ;;  %s2053_s18 = smov 64  }
  0x61   : > { %s2054_s12 = smov 48   ;;  %s2055_s26 = smov 40  }
  0x62   : > { %1788 = vmatpush3.bf16.msra.mxu1 %v1787_v14  ;;  %s2056_s27 = smov 56  }
  0x63   : > { %1702 = vmatprep.subr.mxu1 %v2045_v13 }
  0xe9   : > { %v394_v2 = vpop.xlane.xlu0 %393 }
  0xea   : > { %v396_v3 = vmul.f32 0.03125, %v394_v2 }
  0xec   : > { %v397_v4 = vsub.f32 %v388_v0, %v396_v3 }
  0xee   : > { %v398_v5 = vmul.f32 %v397_v4, %v397_v4 }
  0xf0   : > { %v399_v6 = vsel %vm391_vm0, %v398_v5, 0.0 }
  0xf1   : > { %400 = vadd.xlane.f32.xlu0 %v399_v6 }
 0x17e   : > { %v401_v15 = vpop.xlane.xlu0 %400 }
 0x17f   : > { %v402_v16 = vmul.f32 0.03125, %v401_v15 }
 0x181   : > { %v403_v17 = vadd.f32 1e-05, %v402_v16 }
 0x183   : > { %1887 = vrsqrt.f32 %v403_v17 }
 0x18d   : > { %v1888_v18 = vpop.eup %1887 }
 0x18e   : > { %v405_v20 = vmul.f32 %v1888_v18, %v397_v4 }
 0x190   : > { %v410_v22 = vmul.f32 %v1619_v19, %v405_v20 }
 0x192   : > { %v2293_v23 = vadd.f32 %v1620_v21, %v410_v22  ;;  %v1179_v22 = vld [vmem:[%s2487_s4] sm:$0xff] }
 0x194   : > { %1700 = vmatmul.mubr.msk.f32.vlgmr.msra.gmra.mrb[0].mxu1 %vm391_vm0, %v2293_v23 }
 0x195   : > { %1704 = vmatprep.mubr.msk.f32.mxu1 %vm2044_vm1, %v2045_v13 }
 0x267   : > { %v496_v25 = vpop.f32.mrb[0].mxu1 }
 0x268   : > { %v2302_v26 = vadd.f32 %v1621_v24, %v496_v25  ;;  %v1701_v27 = vpop.f32.mrb[1].mxu1  ;;  %v1180_v24 = vld [vmem:[%s2487_s4 + $0x8] sm:$0xff] }
 0x269   : > { %v1790_v25 = vpack.c.bf16 %v1180_v24, %v1179_v22 }
 0x26a   : > { %502 = vrot.lane.b32.xlu1 %v2302_v26, %s2046_s11  ;;  %v500_v28 = vmul.f32 0.35355338, %v2302_v26 }
 0x26c   : > { %667 = vrot.lane.b32.xlu0 %v500_v28, %s2047_s19 }
 0x26e   : > { %669 = vrot.lane.b32.xlu1 %v2302_v26, %s2048_s21 }
 0x272   : > { %834 = vrot.lane.b32.xlu1 %v2302_v26, %s2049_s23  ;;  %s1516_s23 = scalar_lea.sflag [#allocation4], %s2257_s1 }
 0x276   : > { %999 = vrot.lane.b32.xlu1 %v2302_v26, %s2050_s28 }
 0x27a   : > { %832 = vrot.lane.b32.xlu1 %v500_v28, %s2051_s29 }
 0x27e   : > { %997 = vrot.lane.b32.xlu1 %v500_v28, %s2052_s30 }
 0x2dc   : > { %v503_v29 = vpop.permute.xlu1 %502 }
 0x2dd   : > { %1703 = vmatpush3.xpose.msk.msra.mxu1 %vm504_vm2, %v503_v29  ;;  %v1182_v29 = vld [vmem:[%s2487_s4 + $0x18] sm:$0xff] }
 0x2de   : > { %1707 = vmatprep.subr.mxu1 %v2045_v13  ;;  %v668_v31 = vpop.permute.xlu0 %667 }
 0x2e0   : > { %v670_v30 = vpop.permute.xlu1 %669  ;;  %1705 = vmatmul.mubr.msk.f32.vlgmr.msra.gmra.mrb[2].mxu1 %vm504_vm2, %v500_v28  ;;  %v1181_v28 = vld [vmem:[%s2487_s4 + $0x10] sm:$0xff] }
 0x2e1   : > { %1713 = vmatpush3.xpose.msk.msra.mxu0 %vm504_vm2, %v670_v30  ;;  %1709 = vmatprep.mubr.msk.f32.mxu1 %vm2044_vm1, %v2045_v13  ;;  %v1793_v30 = vpack.c.bf16 %v1182_v29, %v1181_v28 }
 0x2e2   : > { %1722 = vmatprep.subr.mxu0 %v2045_v13 }
 0x2e4   : > { %v835_v32 = vpop.permute.xlu1 %834  ;;  %1715 = vmatmul.mubr.msk.f32.vlgmr.msra.gmra.mrb[0].mxu0 %vm504_vm2, %v668_v31 }
 0x2e5   : > { %1723 = vmatpush3.xpose.msk.msra.mxu0 %vm504_vm2, %v835_v32  ;;  %1724 = vmatprep.mubr.msk.f32.mxu0 %vm2044_vm1, %v2045_v13 }
 0x2e6   : > { %1732 = vmatprep.subr.mxu0 %v2045_v13 }
 0x2e8   : > { %v1000_v33 = vpop.permute.xlu1 %999 }
 0x2ec   : > { %v833_v34 = vpop.permute.xlu1 %832 }
 0x2ed   : > { %1725 = vmatmul.mubr.msk.f32.vlgmr.msra.gmra.mrb[2].mxu0 %vm504_vm2, %v833_v34 }
 0x2ee   : > { %1733 = vmatpush3.xpose.msk.msra.mxu0 %vm504_vm2, %v1000_v33  ;;  %1734 = vmatprep.mubr.msk.f32.mxu0 %vm2044_vm1, %v2045_v13 }
 0x2ef   : > { %1789 = vmatprep.subr.bf16.mxu0 %v2043_v10 }
 0x2f0   : > { %v998_v35 = vpop.permute.xlu1 %997 }
 0x2f1   : > { %1735 = vmatmul.mubr.msk.f32.vlgmr.msra.gmra.mrb[4].mxu0 %vm504_vm2, %v998_v35 }
 0x2f2   : > { %1750 = vmatprep.mubr.msk.f32.mxu0 %vm2044_vm1, %v2045_v13  ;;  %1791 = vmatpush3.bf16.msra.mxu0 %v1790_v25 }
 0x2f3   : > { %1792 = vmatprep.subr.bf16.mxu0 %v2043_v10 }
 0x2f6   : > { %1794 = vmatpush3.bf16.msra.mxu0 %v1793_v30 }
 0x2f7   : > { %1801 = vmatprep.subr.bf16.mxu0 %v2043_v10 }
 0x3b3   : > { %v576_v36 = vpop.f32.mrb[2].mxu1 }
 0x3b4   : > { %v1706_v37 = vpop.f32.mrb[3].mxu1  ;;  %v580_v38 = vsel %vm504_vm2, %v576_v36, -inf }
 0x3b5   : > { %581 = vmax.xlane.f32.xlu1 %v580_v38 }
 0x3b7   : > { %v741_v39 = vpop.f32.mrb[0].mxu0 }
 0x3b8   : > { %v1716_v40 = vpop.f32.mrb[1].mxu0  ;;  %v745_v41 = vsel %vm504_vm2, %v741_v39, -inf }
 0x3b9   : > { %746 = vmax.xlane.f32.xlu0 %v745_v41 }
 0x3c0   : > { %v906_v42 = vpop.f32.mrb[2].mxu0 }
 0x3c1   : > { %v1726_v43 = vpop.f32.mrb[3].mxu0  ;;  %v910_v44 = vsel %vm504_vm2, %v906_v42, -inf }
 0x3c2   : > { %911 = vmax.xlane.f32.xlu1 %v910_v44  ;;  %v1635_v43 = vld [vmem:[%s2488_s5] ss:$0 sm:$0xff] }
 0x3c4   : > { %v1071_v45 = vpop.f32.mrb[4].mxu0 }
 0x3c5   : > { %v1736_v46 = vpop.f32.mrb[5].mxu0  ;;  %v1075_v47 = vsel %vm504_vm2, %v1071_v45, -inf }
 0x3c6   : > { %1076 = vmax.xlane.f32.xlu0 %v1075_v47 }
 0x3d3   : > { %591 = vrot.lane.b32.xlu1 %v2302_v26, %s2053_s18 }
 0x442   : > { %v582_v48 = vpop.xlane.xlu1 %581 }
 0x443   : > { %v583_v49 = vsub.f32 %v576_v36, %v582_v48 }
 0x445   : > { %v584_v50 = vmul.f32 1.442695, %v583_v49 }
 0x446   : > { %v747_v51 = vpop.xlane.xlu0 %746 }
 0x447   : > { %1889 = vpow2.f32 %v584_v50  ;;  %v748_v52 = vsub.f32 %v741_v39, %v747_v51 }
 0x449   : > { %v749_v53 = vmul.f32 1.442695, %v748_v52 }
 0x44b   : > { %1891 = vpow2.f32 %v749_v53 }
 0x44f   : > { %v912_v54 = vpop.xlane.xlu1 %911 }
 0x450   : > { %v913_v55 = vsub.f32 %v906_v42, %v912_v54  ;;  %v1290_v54 = vld [vmem:[%s2489_s6 + $0x8] sm:$0xff] }
 0x451   : > { %v1890_v56 = vpop.eup %1889 }
 0x452   : > { %v914_v57 = vmul.f32 1.442695, %v913_v55  ;;  %v586_v58 = vsel %vm504_vm2, %v1890_v56, 0.0 }
 0x453   : > { %v1077_v59 = vpop.xlane.xlu0 %1076  ;;  %587 = vadd.xlane.f32.xlu1 %v586_v58  ;;  %v592_v60 = vpop.permute.xlu1 %591  ;;  %v1374_v58 = vld [vmem:[%s2491_s8] sm:$0xff] }
 0x454   : > { %1893 = vpow2.f32 %v914_v57  ;;  %v1078_v61 = vsub.f32 %v1071_v45, %v1077_v59  ;;  %1708 = vmatpush3.msra.mxu1 %v592_v60  ;;  %v1375_v59 = vld [vmem:[%s2491_s8 + $0x8] sm:$0xff]  ;;  %v1376_v60 = vld [vmem:[%s2491_s8 + $0x10] sm:$0xff] }
 0x455   : > { %v1892_v62 = vpop.eup %1891  ;;  %1717 = vmatprep.subr.mxu1 %v2045_v13 }
 0x456   : > { %v1079_v63 = vmul.f32 1.442695, %v1078_v61  ;;  %v751_v0 = vsel %vm504_vm2, %v1892_v62, 0.0  ;;  %v1802_v61 = vpack.c.bf16 %v1375_v59, %v1374_v58 }
 0x457   : > { %752 = vadd.xlane.f32.xlu0 %v751_v0  ;;  %v1378_v0 = vld [vmem:[%s2491_s8 + $0x20] sm:$0xff] }
 0x458   : > { %1895 = vpow2.f32 %v1079_v63 }
 0x45e   : > { %v1894_v1 = vpop.eup %1893 }
 0x45f   : > { %v916_v2 = vsel %vm504_vm2, %v1894_v1, 0.0 }
 0x460   : > { %917 = vadd.xlane.f32.xlu1 %v916_v2 }
 0x462   : > { %v1896_v3 = vpop.eup %1895 }
 0x463   : > { %v1081_v4 = vsel %vm504_vm2, %v1896_v3, 0.0 }
 0x464   : > { %1082 = vadd.xlane.f32.xlu0 %v1081_v4 }
 0x471   : > { %921 = vrot.lane.b32.xlu1 %v2302_v26, %s2054_s12  ;;  %s2057_s12 = smov 8  }
 0x475   : > { %1086 = vrot.lane.b32.xlu1 %v2302_v26, %s2055_s26  ;;  %s2058_s26 = smov 16  }
 0x47a   : > { %756 = vrot.lane.b32.xlu0 %v2302_v26, %s2056_s27  ;;  %s2059_s27 = smov 24  }
 0x4e0   : > { %v588_v5 = vpop.xlane.xlu1 %587 }
 0x4e1   : > { %1897 = vrcp.f32 %v588_v5 }
 0x4e4   : > { %v753_v6 = vpop.xlane.xlu0 %752 }
 0x4e5   : > { %1899 = vrcp.f32 %v753_v6 }
 0x4eb   : > { %v1898_v7 = vpop.eup %1897 }
 0x4ec   : > { %v590_v8 = vmul.f32 %v1898_v7, %v1890_v56  ;;  %v1292_v56 = vld [vmem:[%s2489_s6 + $0x18] sm:$0xff]  ;;  %v1637_v7 = vld [vmem:[#allocation5 + $0x2] ss:$0 sm:$0xff] }
 0x4ed   : > { %v918_v9 = vpop.xlane.xlu1 %917 }
 0x4ee   : > { %1901 = vrcp.f32 %v918_v9  ;;  %1710 = vmatmul.mubr.msk.f32.vlgmr.msra.gmra.mrb[4].mxu1 %vm504_vm2, %v590_v8  ;;  %v1638_v9 = vld [vmem:[#allocation5 + $0x3] ss:$0 sm:$0xff] }
 0x4ef   : > { %1719 = vmatprep.mubr.msk.f32.mxu1 %vm2044_vm1, %v2045_v13  ;;  %v1900_v12 = vpop.eup %1899 }
 0x4f0   : > { %v755_v14 = vmul.f32 %v1900_v12, %v1892_v62  ;;  %v1377_v62 = vld [vmem:[%s2491_s8 + $0x18] sm:$0xff] }
 0x4f1   : > { %v1083_v11 = vpop.xlane.xlu0 %1082  ;;  %v922_v15 = vpop.permute.xlu1 %921  ;;  %v1805_v63 = vpack.c.bf16 %v1377_v62, %v1376_v60 }
 0x4f2   : > { %1903 = vrcp.f32 %v1083_v11 }
 0x4f5   : > { %v757_v16 = vpop.permute.xlu0 %756  ;;  %v1087_v19 = vpop.permute.xlu1 %1086 }
 0x4f6   : > { %1718 = vmatpush3.msra.mxu1 %v757_v16  ;;  %v1639_v16 = vld [vmem:[%s2490_s7] ss:$0 sm:$0xff] }
 0x4f7   : > { %1720 = vmatmul.mubr.msk.f32.vlgmr.msra.gmra.mrb[6].mxu1 %vm504_vm2, %v755_v14  ;;  %1727 = vmatprep.subr.mxu1 %v2045_v13  ;;  %v1380_v14 = vld [vmem:[%s2491_s8 + $0x30] sm:$0xff] }
 0x4f8   : > { %v1902_v17 = vpop.eup %1901  ;;  %1728 = vmatpush3.msra.mxu1 %v922_v15  ;;  %1729 = vmatprep.mubr.msk.f32.mxu1 %vm2044_vm1, %v2045_v13 }
 0x4f9   : > { %v920_v18 = vmul.f32 %v1902_v17, %v1894_v1  ;;  %1737 = vmatprep.subr.mxu1 %v2045_v13  ;;  %v1379_v1 = vld [vmem:[%s2491_s8 + $0x28] sm:$0xff] }
 0x4fa   : > { %v1808_v2 = vpack.c.bf16 %v1379_v1, %v1378_v0 }
 0x4fb   : > { %1730 = vmatmul.mubr.msk.f32.vlgmr.msra.gmra.mrb[8].mxu1 %vm504_vm2, %v920_v18 }
 0x4fc   : > { %v1904_v20 = vpop.eup %1903  ;;  %1738 = vmatpush3.msra.mxu1 %v1087_v19  ;;  %1739 = vmatprep.mubr.msk.f32.mxu1 %vm2044_vm1, %v2045_v13 }
 0x4fd   : > { %v1085_v21 = vmul.f32 %v1904_v20, %v1896_v3  ;;  %1795 = vmatprep.subr.bf16.mxu1 %v2043_v10 }
 0x4ff   : > { %1740 = vmatmul.mubr.msk.f32.vlgmr.msra.gmra.mrb[10].mxu1 %vm504_vm2, %v1085_v21  ;;  %v1641_v21 = vld [vmem:[%s2492_s9] ss:$0 sm:$0xff] }
 0x500   : > { %1761 = vmatprep.mubr.msk.f32.mxu1 %vm2044_vm1, %v2045_v13 }
 0x5c1   : > { %v663_v26 = vpop.f32.mrb[4].mxu1 }
 0x5c2   : > { %v1711_v27 = vpop.f32.mrb[5].mxu1 }
 0x5ca   : > { %v828_v31 = vpop.f32.mrb[6].mxu1 }
 0x5cb   : > { %1163 = vrot.lane.b32.xlu0 %v828_v31, %s2057_s12  ;;  %v1721_v32 = vpop.f32.mrb[7].mxu1  ;;  %s1648_s12 = sshll.u32 %s2137_s17, 7  ;;  %s2060_s17 = smov [#allocation7]  }
 0x5cc   : > { %s2438_s21 = scalar_lea.hbm %s2493_s10, %s1648_s12 }
 0x5ce   : > { %v993_v33 = vpop.f32.mrb[8].mxu1 }
 0x5cf   : > { %1167 = vrot.lane.b32.xlu1 %v993_v33, %s2058_s26  ;;  %v1731_v34 = vpop.f32.mrb[9].mxu1  ;;  %s387_s26 = scalar_lea.vmem [#allocation7], %s1616_s22  ;;  %s1973_s22 = sshll.u32 %s2060_s17, 4  ;;  %s1974_s22 = int_to_ptr.vmem [resolvable:$false] %s1973_s22 }
 0x5d0   : > { %s1975_s29 = scalar_lea.vmem %s1974_s22, 256 }
 0x5d2   : > { %v1158_v35 = vpop.f32.mrb[10].mxu1 }
 0x5d3   : > { %1171 = vrot.lane.b32.xlu0 %v1158_v35, %s2059_s27  ;;  %v1741_v36 = vpop.f32.mrb[11].mxu1  ;;  %s1529_s27 = sshll.u32 %s387_s26, 4  ;;  %s2440_s27 = int_to_ptr.vmem [resolvable:$true] %s1529_s27 }
 0x5d4   : > { %s1969_s28 = scalar_lea.vmem %s2440_s27, 128  ;;  %p1976_p13 = scmp.lt.s32.totalorder %s2440_s27, %s1974_s22 }
 0x5d5   : > { %p1970_p6 = scmp.ne.s32.totalorder %s2440_s27, %s1969_s28  ;;  %p1977_p0 = scmp.lt.s32.totalorder %s1975_s29, %s1969_s28 }
 0x5d7   : > { %p1971_p9 = pnand %p1970_p6, %p2208_p8  ;;  %p1978_p5 = por %p1977_p0, %p1976_p13 }
 0x5d9   : > { %p1972_p12 = pneg %p1971_p9 }
 0x5db   : > { %p1979_p10 = pnand %p1978_p5, %p1972_p12 }
 0x63d   : > { %v1164_v37 = vpop.permute.xlu0 %1163 }
 0x63e   : > { %v1174_v39 = vsel %vm504_vm2, %v663_v26, %v1164_v37  ;;  %v1643_v37 = vld [vmem:[#allocation5 + $0x4] ss:$0 sm:$0xff] }
 0x641   : > { %v1168_v38 = vpop.permute.xlu1 %1167 }
 0x642   : > { %v1176_v40 = vsel %vm1175_vm3, %v1174_v39, %v1168_v38  ;;  %v1644_v39 = vld [vmem:[#allocation5 + $0x5] ss:$0 sm:$0xff] }
 0x645   : > { %v1172_v41 = vpop.permute.xlu0 %1171 }
 0x646   : > { %v1178_v42 = vsel %vm1177_vm4, %v1176_v40, %v1172_v41 }
 0x647   : > { %1751 = vmatmul.mubr.msk.f32.vlgmr.msra.gmra.mrb[6].mxu0 %vm391_vm0, %v1178_v42 }
 0x648   : > { %1780 = vmatprep.mubr.msk.f32.mxu0 %vm2044_vm1, %v2045_v13  ;;  %v1289_v13 = vld [vmem:[%s2489_s6] sm:$0xff]  ;;  %1803 = vmatpush3.bf16.msra.mxu0 %v1802_v61 }
 0x649   : > { %v1796_v55 = vpack.c.bf16 %v1290_v54, %v1289_v13  ;;  %1804 = vmatprep.subr.bf16.mxu0 %v2043_v10  ;;  %v1646_v13 = vld [vmem:[#allocation5 + $0x7] ss:$0 sm:$0xff] }
 0x64b   : > { %1797 = vmatpush3.bf16.msra.mxu1 %v1796_v55 }
 0x64c   : > { %1798 = vmatprep.subr.bf16.mxu1 %v2043_v10  ;;  %1806 = vmatpush3.bf16.msra.mxu0 %v1805_v63 }
 0x64d   : > { %1807 = vmatprep.subr.bf16.mxu0 %v2043_v10 }
 0x650   : > { %1809 = vmatpush3.bf16.msra.mxu0 %v1808_v2 }
 0x651   : > { %1810 = vmatprep.subr.bf16.mxu0 %v2043_v10  ;;  %v1381_v10 = vld [vmem:[%s2491_s8 + $0x38] sm:$0xff] }
 0x652   : > { %v1811_v15 = vpack.c.bf16 %v1381_v10, %v1380_v14 }
 0x654   : > { %1812 = vmatpush3.bf16.msra.mxu0 %v1811_v15 }
 0x71a   : > { %v1259_v44 = vpop.f32.mrb[6].mxu0 }
 0x71b   : > { %v1260_v45 = vadd.f32 %v1635_v43, %v1259_v44  ;;  %v1752_v46 = vpop.f32.mrb[7].mxu0 }
 0x71d   : > { %v1263_v47 = vadd.f32 %v1260_v45, %v2293_v23  ;;  %v1291_v23 = vld [vmem:[%s2489_s6 + $0x10] sm:$0xff] }
 0x71e   : > { %v1799_v57 = vpack.c.bf16 %v1292_v56, %v1291_v23 }
 0x71f   : > { %v1266_v48 = vsel %vm391_vm0, %v1263_v47, 0.0 }
 0x720   : > { %1267 = vadd.xlane.f32.xlu1 %v1266_v48  ;;  %1800 = vmatpush3.bf16.msra.mxu1 %v1799_v57 }
 0x7ad   : > { %v1268_v49 = vpop.xlane.xlu1 %1267 }
 0x7ae   : > { %v1269_v50 = vmul.f32 0.03125, %v1268_v49 }
 0x7b0   : > { %v1270_v51 = vsub.f32 %v1263_v47, %v1269_v50 }
 0x7b2   : > { %v1271_v52 = vmul.f32 %v1270_v51, %v1270_v51 }
 0x7b4   : > { %v1272_v53 = vsel %vm391_vm0, %v1271_v52, 0.0  ;;  %v1645_v52 = vld [vmem:[#allocation5 + $0x6] ss:$0 sm:$0xff] }
 0x7b5   : > { %1273 = vadd.xlane.f32.xlu0 %v1272_v53 }
 0x842   : > { %v1274_v3 = vpop.xlane.xlu0 %1273 }
 0x843   : > { %v1275_v4 = vmul.f32 0.03125, %v1274_v3 }
 0x845   : > { %v1276_v5 = vadd.f32 1e-05, %v1275_v4 }
 0x847   : > { %1905 = vrsqrt.f32 %v1276_v5 }
 0x851   : > { %v1906_v6 = vpop.eup %1905 }
 0x852   : > { %v1278_v8 = vmul.f32 %v1906_v6, %v1270_v51 }
 0x854   : > { %v1283_v11 = vmul.f32 %v1637_v7, %v1278_v8 }
 0x856   : > { %v1288_v12 = vadd.f32 %v1638_v9, %v1283_v11 }
 0x858   : > { %1762 = vmatmul.mubr.msk.f32.vlgmr.msra.gmra.mrb[12].mxu1 %vm391_vm0, %v1288_v12 }
 0x92b   : > { %v1369_v17 = vpop.f32.mrb[12].mxu1 }
 0x92c   : > { %v1370_v18 = vadd.f32 %v1639_v16, %v1369_v17  ;;  %v1763_v19 = vpop.f32.mrb[13].mxu1 }
 0x92e   : > { %v1373_v20 = vmax.f32 %v1370_v18, 0.0 }
 0x930   : > { %1781 = vmatmul.mubr.msk.f32.vlgmr.msra.gmra.mrb[8].mxu0 %vm1389_vm5, %v1373_v20 }
 0xa03   : > { %v1459_v22 = vpop.f32.mrb[8].mxu0 }
 0xa04   : > { %v1460_v24 = vadd.f32 %v1641_v21, %v1459_v22  ;;  %v1782_v25 = vpop.f32.mrb[9].mxu0 }
 0xa06   : > { %v1463_v26 = vadd.f32 %v1460_v24, %v1288_v12 }
 0xa08   : > { %v1466_v27 = vsel %vm391_vm0, %v1463_v26, 0.0 }
 0xa09   : > { %1467 = vadd.xlane.f32.xlu0 %v1466_v27 }
 0xa96   : > { %v1468_v28 = vpop.xlane.xlu0 %1467 }
 0xa97   : > { %v1469_v29 = vmul.f32 0.03125, %v1468_v28 }
 0xa99   : > { %v1470_v30 = vsub.f32 %v1463_v26, %v1469_v29 }
 0xa9b   : > { %v1471_v31 = vmul.f32 %v1470_v30, %v1470_v30 }
 0xa9d   : > { %v1472_v32 = vsel %vm391_vm0, %v1471_v31, 0.0 }
 0xa9e   : > { %1473 = vadd.xlane.f32.xlu1 %v1472_v32 }
 0xb2b   : > { %v1474_v33 = vpop.xlane.xlu1 %1473 }
 0xb2c   : > { %v1475_v34 = vmul.f32 0.03125, %v1474_v33 }
 0xb2e   : > { %v1476_v35 = vadd.f32 1e-05, %v1475_v34 }
 0xb30   : > { %1907 = vrsqrt.f32 %v1476_v35 }
 0xb3a   : > { %v1908_v36 = vpop.eup %1907 }
 0xb3b   : > { %v1478_v38 = vmul.f32 %v1908_v36, %v1470_v30 }
 0xb3d   : > { %v1483_v40 = vmul.f32 %v1643_v37, %v1478_v38 }
 0xb3f   : > { %v1488_v41 = vadd.f32 %v1644_v39, %v1483_v40 }
 0xb41   : > { %v1491_v42 = vsel %vm391_vm0, %v1488_v41, 0.0 }
 0xb42   : > { %1492 = vadd.xlane.f32.xlu0 %v1491_v42 }
 0xbcf   : > { %v1493_v43 = vpop.xlane.xlu0 %1492 }
 0xbd0   : > { %v1494_v44 = vmul.f32 0.03125, %v1493_v43 }
 0xbd2   : > { %v1495_v45 = vsub.f32 %v1488_v41, %v1494_v44 }
 0xbd4   : > { %v1496_v46 = vmul.f32 %v1495_v45, %v1495_v45 }
 0xbd6   : > { %v1497_v47 = vsel %vm391_vm0, %v1496_v46, 0.0 }
 0xbd7   : > { %1498 = vadd.xlane.f32.xlu1 %v1497_v47 }
 0xc64   : > { %v1499_v48 = vpop.xlane.xlu1 %1498 }
 0xc65   : > { %v1500_v49 = vmul.f32 0.03125, %v1499_v48 }
 0xc67   : > { %v1501_v50 = vadd.f32 1e-05, %v1500_v49 }
 0xc69   : > { %1909 = vrsqrt.f32 %v1501_v50 }
 0xc73   : > { %v1910_v51 = vpop.eup %1909 }
 0xc74   : > { %v1503_v53 = vmul.f32 %v1910_v51, %v1495_v45 }
 0xc76   : > { %v1508_v54 = vmul.f32 %v1645_v52, %v1503_v53 }
 0xc78   : > { %v1513_v55 = vadd.f32 %v1646_v13, %v1508_v54 }
 0xc7a   : > { %1514 = vst.msk [vmem:[%s387_s26] sm:$0xff] %vm391_vm0, %v1513_v55 }
 0xc7b   : > { %1982 = shalt.err (!%p1979_p10)
}
 0xc7c   : > { %s1983_s1 = scalar_lea.hbm %s2438_s21, 128  ;;  %s1987_s12 = scalar_lea.hbm %s2493_s10, 256 }
 0xc7d   : > { %p1984_p1 = scmp.ne.s32.totalorder %s2438_s21, %s1983_s1  ;;  %p1988_p3 = scmp.lt.u32.totalorder %s2438_s21, %s2493_s10 }
 0xc7e   : > { %p1989_p11 = scmp.lt.u32.totalorder %s1987_s12, %s1983_s1  ;;  %p1991_p6 = scmp.lt.u32.totalorder %s1983_s1, %s2438_s21 }
 0xc7f   : > { %p1985_p2 = pnand %p1984_p1, %p2208_p8 }
 0xc80   : > { %p1990_p4 = por %p1989_p11, %p1988_p3 }
 0xc81   : > { %p1986_p7 = pneg %p1985_p2 }
 0xc82   : > { %p1992_p9 = por %p1991_p6, %p1990_p4 }
 0xc84   : > { %p1993_p12 = pnand %p1992_p9, %p1986_p7 }
 0xc86   : > { %1996 = shalt.err (!%p1993_p12)
}
 0xc87   : > { %1819 = dma.vmem_to_hbm [thread:$0]  (%p2208_p8), %s2440_s27, 128, %s2438_s21, %s1516_s23  }
 0xc88 PF: > { %s1541_s19 = sand.u32 1, %s2027_s13   ;;  %p2517_p13 = scmp.ne.s32.totalorder %s2501_s20, 0 }
 0xc89   : > { %p2518_p0 = scmp.ge.s32.totalorder %s2039_s16, 2  ;;  %s1542_s28 = scalar_lea.sflag [#allocation4], %s1541_s19 }
 0xc8b   : > { %p1830_p5 = pnand %p2518_p0, %p2517_p13 }
 0xc8d   : > { %2022 = dma.done.wait (!%p1830_p5), %s1542_s28, 128  }
 0xc8e   : > { %2024 = vsyncadd (!%p1830_p5), %s1542_s28, 4294967168  ;;  %s2519_s16 = sld [smem:[#allocation11_spill]]  ;;  %s2520_s13 = smov %s2031_s14 }
 0xc8f   : > { %s2521_s14 = smov %s2035_s15  ;;  %s2522_s15 = smov %s2200_s24 }
 0xc94   : > { %p24_p10 = scmp.ge.s32.totalorder %s2519_s16, 4  }
 0xc96   :  { %26 = sbr.rel (!%p24_p10) target bundleno = 8 (0x8), region = 109 }
 0xc9d   :  { %1547 = vsyncpa [#allocation3], 1 }
 0xc9e   :  { %1549 = vsyncpa [#allocation3 + $0x1], 1 }
 0xc9f   :  { %1550 = vsyncpa [#allocation6], 1 }
 0xca0   :  { %1551 = vsyncpa [#allocation4], 1 }
 0xca1   :  { %1553 = vsyncpa [#allocation4 + $0x1], 1 }

</bundles_post_ra>
